<compile_context>
chip_gen: v7x
topology: tpu7x:2x2x1
jax: 0.10.0
libtpu: 0.0.40
codegen_flags: <defaults>
</compile_context>

<pallas_src>
import functools

import numpy as np
import jax
import jax.numpy as jnp
from jax.experimental import pallas as pl
from jax.experimental.pallas import tpu as pltpu


def _round_up(v, m):
    return ((v + m - 1) // m) * m


def _pack_params(mlp1_params, mlp2_params):
    """Pack all (W, b) pairs into one lane-padded f32 slab.

    Returns (slab, meta1, meta2, lane) where meta* is a list of static-int
    tuples (w_row_off, in_features, out_features_for_kernel, b_row_off).
    The LAST layer of mlp2 uses out_features_for_kernel == lane so the final
    matmul / output store is lane-dense; the extra columns are zero.
    """
    all_params = list(mlp1_params) + list(mlp2_params)
    max_dim = max(max(W.shape[0], W.shape[1]) for W, _ in all_params)
    lane = max(128, _round_up(max_dim, 128))

    rows = 0
    placements = []

    def place(arr2d):
        nonlocal rows
        off = rows
        rows += _round_up(arr2d.shape[0], 8)   # 8-row alignment for tile-aligned slices
        placements.append((off, arr2d))
        return off

    def build(params, pad_last):
        meta = []
        n = len(params)
        for i, (W, b) in enumerate(params):
            W = jnp.asarray(W, jnp.float32)
            b = jnp.asarray(b, jnp.float32).reshape(1, -1)
            in_f, out_f = W.shape
            w_off = place(W)
            b_off = place(b)
            eff_out = lane if (pad_last and i == n - 1) else out_f
            meta.append((w_off, in_f, eff_out, b_off))
        return meta

    meta1 = build(mlp1_params, pad_last=False)
    meta2 = build(mlp2_params, pad_last=True)

    slab = jnp.zeros((rows, lane), jnp.float32)
    for off, arr in placements:
        slab = slab.at[off:off + arr.shape[0], :arr.shape[1]].set(arr)
    return slab, meta1, meta2, lane


def _make_pointnet_kernel(C, N, H1, meta1, meta2, lane):
    """Single-invocation kernel: all arrays are tiny and live fully in VMEM."""

    def kernel(pts_ref, prm_ref, out_ref):
        pts = pts_ref[...]                       # (C, N, feat) f32
        px = pts[:, :, 0:1]                      # (C, N, 1) -- [..., :3] slice
        py = pts[:, :, 1:2]
        pz = pts[:, :, 2:3]

        # ---- MLP1 first layer (in_features == 3) as VPU broadcast-FMAs ------
        w_off, _in3, f0, b_off = meta1[0]
        w0 = prm_ref[w_off + 0:w_off + 1, 0:f0]  # (1, f0)
        w1 = prm_ref[w_off + 1:w_off + 2, 0:f0]
        w2 = prm_ref[w_off + 2:w_off + 3, 0:f0]
        b0 = prm_ref[b_off:b_off + 1, 0:f0]

        def first_layer(cx, cy, cz):
            # cx/cy/cz: (..., 1) -> (..., f0); pure VPU, MXU is skipped for K=3.
            return cx * w0 + cy * w1 + cz * w2 + b0

        def rest_layers(h2d, meta):
            # h2d: (M, f0) output of the first layer. SiLU between layers,
            # linear final layer.
            for li in range(1, len(meta)):
                h2d = h2d * jax.nn.sigmoid(h2d)          # SiLU on hidden output
                wo, fi, fo, bo = meta[li]
                W = prm_ref[wo:wo + fi, 0:fo]
                bb = prm_ref[bo:bo + 1, 0:fo]
                h2d = jnp.dot(h2d, W, preferred_element_type=jnp.float32) + bb
            return h2d

        # ---- layers[2]: pointwise MLP over all boundary points (flat 2-D) ---
        h = first_layer(px.reshape(C * N, 1),
                        py.reshape(C * N, 1),
                        pz.reshape(C * N, 1))            # (C*N, f0)
        h = rest_layers(h, meta1)                        # (C*N, H1)
        h3 = h.reshape(C, N, H1)

        # ---- torch.max(ptlatent, 1): value + first argmax over points -------
        maxv = jnp.max(h3, axis=1, keepdims=True)                      # (C,1,H1)
        it_n = jax.lax.broadcasted_iota(jnp.int32, (C, N, H1), 1)
        idx = jnp.min(jnp.where(h3 == maxv, it_n, N), axis=1)          # (C, H1)

        # ---- fixed_ind: gather argmax points, staying in (C, N, H1) layout --
        sel = it_n == idx[:, None, :]                                  # (C,N,H1)
        fx = jnp.sum(jnp.where(sel, px, 0.0), axis=1)                  # (C, H1)
        fy = jnp.sum(jnp.where(sel, py, 0.0), axis=1)
        fz = jnp.sum(jnp.where(sel, pz, 0.0), axis=1)

        # ---- layers[2] again on gathered points, then max over dim 1 --------
        h2 = first_layer(fx[:, :, None], fy[:, :, None], fz[:, :, None])
        h2 = rest_layers(h2.reshape(C * H1, f0), meta1).reshape(C, H1, H1)
        latent0 = jnp.max(h2, axis=1)                                  # (C, H1)

        # ---- layers[4]: second MLP; final layer pre-padded to `lane` cols ---
        g = latent0
        n2 = len(meta2)
        for li, (wo, fi, fo, bo) in enumerate(meta2):
            W = prm_ref[wo:wo + fi, 0:fo]
            bb = prm_ref[bo:bo + 1, 0:fo]
            g = jnp.dot(g, W, preferred_element_type=jnp.float32) + bb
            if li < n2 - 1:
                g = g * jax.nn.sigmoid(g)

        out_ref[...] = g                                               # (C, lane)

    return kernel


def pointnet_forward(x, case_boundary_pts, mlp1_params, mlp2_params):
    """Pallas implementation of PointNet.forward.

    x                : (batch, 1) integer case ids (CaseIDArchCore -> one-hot).
    case_boundary_pts: (caseNum, n_pts, feat>=3) fixed boundary point buffer.
    """
    C, N, _feat = case_boundary_pts.shape
    H1 = mlp1_params[-1][0].shape[1]
    out_dim = mlp2_params[-1][0].shape[1]

    slab, meta1, meta2, lane = _pack_params(mlp1_params, mlp2_params)
    kernel = _make_pointnet_kernel(C, N, H1, meta1, meta2, lane)

    vmem = functools.partial(pl.BlockSpec, memory_space=pltpu.MemorySpace.VMEM)
    latent = pl.pallas_call(
        kernel,
        out_shape=jax.ShapeDtypeStruct((C, lane), jnp.float32),
        in_specs=[vmem(), vmem()],
        out_specs=vmem(),
    )(case_boundary_pts.astype(jnp.float32), slab)

    # TPlatent = one_hot(caseID) @ latent == row gather; done in XLA so the
    # kernel output stays lane-dense and batch-independent.
    # TODO(synk): CaseIDArchCore's source is not included; one-hot(x[:, 0]) assumed.
    case_ids = x[:, 0].astype(jnp.int32)
    return jnp.take(latent, case_ids, axis=0)[:, :out_dim]


def pointnet_reference(x, case_boundary_pts, mlp1_params, mlp2_params):
    """Pure-JAX reference mirroring the PyTorch forward semantics."""
    pts = case_boundary_pts[..., :3].astype(jnp.float32)
    case_num = pts.shape[0]
    caseid = jax.nn.one_hot(x[:, 0].astype(jnp.int32), case_num, dtype=jnp.float32)

    def mlp(h, layers):
        for i, (W, b) in enumerate(layers):
            h = jnp.matmul(h, W) + b
            if i < len(layers) - 1:
                h = h * jax.nn.sigmoid(h)
        return h

    h = mlp(pts, mlp1_params)                                   # (C, N, H1)
    idx = jnp.argmax(h, axis=1)                                 # (C, H1) first max
    fixed = jnp.take_along_axis(pts, idx[..., None], axis=1)    # (C, H1, 3)
    h2 = mlp(fixed, mlp1_params)                                # (C, H1, H1)
    latent0 = jnp.max(h2, axis=1)                               # (C, H1)
    latent = mlp(latent0, mlp2_params)                          # (C, out)
    return caseid @ latent                                      # (batch, out)


if __name__ == "__main__":
    key = jax.random.PRNGKey(0)

    # Small shapes consistent with the module's constructor / forward.
    case_num = 3                       # caseBoundarypt.shape[0]
    n_pts = 16                         # boundary sample points per case
    pn_layer_sizeList1 = [16, 32]      # layers[2]: 3 -> 16 -> 32
    pn_layer_sizeList2 = [32]          # layers[4]: 32 -> 32 -> total_modes*ge_features
    total_modes, ge_features = 4, 2
    batch = 2

    def init_mlp(key, sizes):
        # PyTorch nn.Linear default init (uniform +/- 1/sqrt(fan_in)), W stored (in, out).
        params = []
        for fan_in, fan_out in zip(sizes[:-1], sizes[1:]):
            key, kw, kb = jax.random.split(key, 3)
            bound = 1.0 / np.sqrt(fan_in)
            W = jax.random.uniform(kw, (fan_in, fan_out), jnp.float32, -bound, bound)
            b = jax.random.uniform(kb, (fan_out,), jnp.float32, -bound, bound)
            params.append((W, b))
        return key, params

    key, kpts, kx = jax.random.split(key, 3)
    case_boundary_pts = jax.random.normal(kpts, (case_num, n_pts, 4), jnp.float32)
    x = jax.random.randint(kx, (batch, 1), 0, case_num, jnp.int32)

    key, mlp1_params = init_mlp(key, [3] + pn_layer_sizeList1)
    key, mlp2_params = init_mlp(
        key, [pn_layer_sizeList1[-1]] + pn_layer_sizeList2
             + [total_modes * ge_features])

    out = pointnet_forward(x, case_boundary_pts, mlp1_params, mlp2_params)
    out = jax.block_until_ready(out)

    ref = pointnet_reference(x, case_boundary_pts, mlp1_params, mlp2_params)
    np.testing.assert_allclose(np.asarray(out), np.asarray(ref),
                               rtol=2e-3, atol=2e-3)
    print("KERNEL_OK")
</pallas_src>

<mosaic_0001>
module attributes {stable_mosaic.version = 11 : i64} {
  func.func @kernel(%arg0: memref<3x16x4xf32, #tpu.memory_space<vmem>>, %arg1: memref<120x128xf32, #tpu.memory_space<vmem>>, %arg2: memref<3x128xf32, #tpu.memory_space<vmem>>) attributes {dimension_semantics = [], scalar_prefetch = 0 : i64, scratch_operands = 0 : i64, tpu.core_type = #tpu.core_type<tc>} {
    %c0 = arith.constant 0 : index
    %c0_0 = arith.constant 0 : index
    %c0_1 = arith.constant 0 : index
    %0 = vector.load %arg0[%c0, %c0_0, %c0_1] : memref<3x16x4xf32, #tpu.memory_space<vmem>>, vector<3x16x4xf32>
    %1 = vector.extract_strided_slice %0 {offsets = [0, 0, 0], sizes = [3, 16, 1], strides = [1, 1, 1]} : vector<3x16x4xf32> to vector<3x16x1xf32>
    %2 = vector.extract_strided_slice %0 {offsets = [0, 0, 1], sizes = [3, 16, 1], strides = [1, 1, 1]} : vector<3x16x4xf32> to vector<3x16x1xf32>
    %3 = vector.extract_strided_slice %0 {offsets = [0, 0, 2], sizes = [3, 16, 1], strides = [1, 1, 1]} : vector<3x16x4xf32> to vector<3x16x1xf32>
    %c0_2 = arith.constant 0 : index
    %c0_3 = arith.constant 0 : index
    %4 = vector.load %arg1[%c0_2, %c0_3] : memref<120x128xf32, #tpu.memory_space<vmem>>, vector<1x16xf32>
    %c1 = arith.constant 1 : index
    %c0_4 = arith.constant 0 : index
    %5 = vector.load %arg1[%c1, %c0_4] : memref<120x128xf32, #tpu.memory_space<vmem>>, vector<1x16xf32>
    %c2 = arith.constant 2 : index
    %c0_5 = arith.constant 0 : index
    %6 = vector.load %arg1[%c2, %c0_5] : memref<120x128xf32, #tpu.memory_space<vmem>>, vector<1x16xf32>
    %c8 = arith.constant 8 : index
    %c0_6 = arith.constant 0 : index
    %7 = vector.load %arg1[%c8, %c0_6] : memref<120x128xf32, #tpu.memory_space<vmem>>, vector<1x16xf32>
    %8 = vector.shape_cast %1 : vector<3x16x1xf32> to vector<48x1xf32>
    %9 = vector.shape_cast %2 : vector<3x16x1xf32> to vector<48x1xf32>
    %10 = vector.shape_cast %3 : vector<3x16x1xf32> to vector<48x1xf32>
    %11 = vector.broadcast %8 : vector<48x1xf32> to vector<48x16xf32>
    %12 = vector.broadcast %4 : vector<1x16xf32> to vector<48x16xf32>
    %13 = arith.mulf %11, %12 : vector<48x16xf32>
    %14 = vector.broadcast %9 : vector<48x1xf32> to vector<48x16xf32>
    %15 = vector.broadcast %5 : vector<1x16xf32> to vector<48x16xf32>
    %16 = arith.mulf %14, %15 : vector<48x16xf32>
    %17 = arith.addf %13, %16 : vector<48x16xf32>
    %18 = vector.broadcast %10 : vector<48x1xf32> to vector<48x16xf32>
    %19 = vector.broadcast %6 : vector<1x16xf32> to vector<48x16xf32>
    %20 = arith.mulf %18, %19 : vector<48x16xf32>
    %21 = arith.addf %17, %20 : vector<48x16xf32>
    %22 = vector.broadcast %7 : vector<1x16xf32> to vector<48x16xf32>
    %23 = arith.addf %21, %22 : vector<48x16xf32>
    %24 = arith.negf %23 : vector<48x16xf32>
    %25 = math.exp %24 : vector<48x16xf32>
    %cst = arith.constant 1.000000e+00 : f32
    %26 = vector.broadcast %cst : f32 to vector<48x16xf32>
    %27 = arith.addf %26, %25 : vector<48x16xf32>
    %28 = arith.divf %26, %27 : vector<48x16xf32>
    %29 = arith.mulf %23, %28 : vector<48x16xf32>
    %c16 = arith.constant 16 : index
    %c0_7 = arith.constant 0 : index
    %30 = vector.load %arg1[%c16, %c0_7] : memref<120x128xf32, #tpu.memory_space<vmem>>, vector<16x32xf32>
    %c32 = arith.constant 32 : index
    %c0_8 = arith.constant 0 : index
    %31 = vector.load %arg1[%c32, %c0_8] : memref<120x128xf32, #tpu.memory_space<vmem>>, vector<1x32xf32>
    %cst_9 = arith.constant dense<0.000000e+00> : vector<48x32xf32>
    %32 = tpu.matmul %29, %30, %cst_9 {dimension_numbers = #tpu.dot_dimension_numbers<[1], [0], [0], [1], [0, 0, 1, 1], [], []>} : vector<48x16xf32>, vector<16x32xf32>, vector<48x32xf32> -> vector<48x32xf32>
    %33 = vector.broadcast %31 : vector<1x32xf32> to vector<48x32xf32>
    %34 = arith.addf %32, %33 : vector<48x32xf32>
    %35 = vector.shape_cast %34 : vector<48x32xf32> to vector<3x16x32xf32>
    %cst_10 = arith.constant dense<0xFF800000> : vector<3x32xf32>
    %36 = vector.multi_reduction <maximumf>, %35, %cst_10 [1] : vector<3x16x32xf32> to vector<3x32xf32>
    %37 = vector.shape_cast %36 : vector<3x32xf32> to vector<3x1x32xf32>
    %38 = tpu.iota {dimensions = array<i32: 1>} : vector<3x16x32xi32>
    %39 = vector.broadcast %37 : vector<3x1x32xf32> to vector<3x16x32xf32>
    %40 = arith.cmpf oeq, %35, %39 : vector<3x16x32xf32>
    %c16_i32 = arith.constant 16 : i32
    %41 = vector.broadcast %c16_i32 : i32 to vector<3x16x32xi32>
    %42 = arith.select %40, %38, %41 : vector<3x16x32xi1>, vector<3x16x32xi32>
    %cst_11 = arith.constant dense<2147483647> : vector<3x32xi32>
    %43 = vector.multi_reduction <minsi>, %42, %cst_11 [1] : vector<3x16x32xi32> to vector<3x32xi32>
    %44 = vector.shape_cast %43 : vector<3x32xi32> to vector<3x1x32xi32>
    %45 = vector.broadcast %44 : vector<3x1x32xi32> to vector<3x16x32xi32>
    %46 = arith.cmpi eq, %38, %45 : vector<3x16x32xi32>
    %cst_12 = arith.constant 0.000000e+00 : f32
    %47 = vector.shape_cast %1 : vector<3x16x1xf32> to vector<3x16x1xf32>
    %48 = vector.broadcast %47 : vector<3x16x1xf32> to vector<3x16x32xf32>
    %49 = vector.broadcast %cst_12 : f32 to vector<3x16x32xf32>
    %50 = arith.select %46, %48, %49 : vector<3x16x32xi1>, vector<3x16x32xf32>
    %cst_13 = arith.constant dense<0.000000e+00> : vector<3x32xf32>
    %51 = vector.multi_reduction <add>, %50, %cst_13 [1] : vector<3x16x32xf32> to vector<3x32xf32>
    %cst_14 = arith.constant 0.000000e+00 : f32
    %52 = vector.shape_cast %2 : vector<3x16x1xf32> to vector<3x16x1xf32>
    %53 = vector.broadcast %52 : vector<3x16x1xf32> to vector<3x16x32xf32>
    %54 = vector.broadcast %cst_14 : f32 to vector<3x16x32xf32>
    %55 = arith.select %46, %53, %54 : vector<3x16x32xi1>, vector<3x16x32xf32>
    %cst_15 = arith.constant dense<0.000000e+00> : vector<3x32xf32>
    %56 = vector.multi_reduction <add>, %55, %cst_15 [1] : vector<3x16x32xf32> to vector<3x32xf32>
    %cst_16 = arith.constant 0.000000e+00 : f32
    %57 = vector.shape_cast %3 : vector<3x16x1xf32> to vector<3x16x1xf32>
    %58 = vector.broadcast %57 : vector<3x16x1xf32> to vector<3x16x32xf32>
    %59 = vector.broadcast %cst_16 : f32 to vector<3x16x32xf32>
    %60 = arith.select %46, %58, %59 : vector<3x16x32xi1>, vector<3x16x32xf32>
    %cst_17 = arith.constant dense<0.000000e+00> : vector<3x32xf32>
    %61 = vector.multi_reduction <add>, %60, %cst_17 [1] : vector<3x16x32xf32> to vector<3x32xf32>
    %62 = vector.shape_cast %51 : vector<3x32xf32> to vector<3x32x1xf32>
    %63 = vector.shape_cast %56 : vector<3x32xf32> to vector<3x32x1xf32>
    %64 = vector.shape_cast %61 : vector<3x32xf32> to vector<3x32x1xf32>
    %65 = vector.shape_cast %4 : vector<1x16xf32> to vector<1x1x16xf32>
    %66 = vector.broadcast %62 : vector<3x32x1xf32> to vector<3x32x16xf32>
    %67 = vector.broadcast %65 : vector<1x1x16xf32> to vector<3x32x16xf32>
    %68 = arith.mulf %66, %67 : vector<3x32x16xf32>
    %69 = vector.shape_cast %5 : vector<1x16xf32> to vector<1x1x16xf32>
    %70 = vector.broadcast %63 : vector<3x32x1xf32> to vector<3x32x16xf32>
    %71 = vector.broadcast %69 : vector<1x1x16xf32> to vector<3x32x16xf32>
    %72 = arith.mulf %70, %71 : vector<3x32x16xf32>
    %73 = arith.addf %68, %72 : vector<3x32x16xf32>
    %74 = vector.shape_cast %6 : vector<1x16xf32> to vector<1x1x16xf32>
    %75 = vector.broadcast %64 : vector<3x32x1xf32> to vector<3x32x16xf32>
    %76 = vector.broadcast %74 : vector<1x1x16xf32> to vector<3x32x16xf32>
    %77 = arith.mulf %75, %76 : vector<3x32x16xf32>
    %78 = arith.addf %73, %77 : vector<3x32x16xf32>
    %79 = vector.shape_cast %7 : vector<1x16xf32> to vector<1x1x16xf32>
    %80 = vector.broadcast %79 : vector<1x1x16xf32> to vector<3x32x16xf32>
    %81 = arith.addf %78, %80 : vector<3x32x16xf32>
    %82 = vector.shape_cast %81 : vector<3x32x16xf32> to vector<96x16xf32>
    %83 = arith.negf %82 : vector<96x16xf32>
    %84 = math.exp %83 : vector<96x16xf32>
    %cst_18 = arith.constant 1.000000e+00 : f32
    %85 = vector.broadcast %cst_18 : f32 to vector<96x16xf32>
    %86 = arith.addf %85, %84 : vector<96x16xf32>
    %87 = arith.divf %85, %86 : vector<96x16xf32>
    %88 = arith.mulf %82, %87 : vector<96x16xf32>
    %c16_19 = arith.constant 16 : index
    %c0_20 = arith.constant 0 : index
    %89 = vector.load %arg1[%c16_19, %c0_20] : memref<120x128xf32, #tpu.memory_space<vmem>>, vector<16x32xf32>
    %c32_21 = arith.constant 32 : index
    %c0_22 = arith.constant 0 : index
    %90 = vector.load %arg1[%c32_21, %c0_22] : memref<120x128xf32, #tpu.memory_space<vmem>>, vector<1x32xf32>
    %cst_23 = arith.constant dense<0.000000e+00> : vector<96x32xf32>
    %91 = tpu.matmul %88, %89, %cst_23 {dimension_numbers = #tpu.dot_dimension_numbers<[1], [0], [0], [1], [0, 0, 1, 1], [], []>} : vector<96x16xf32>, vector<16x32xf32>, vector<96x32xf32> -> vector<96x32xf32>
    %92 = vector.broadcast %90 : vector<1x32xf32> to vector<96x32xf32>
    %93 = arith.addf %91, %92 : vector<96x32xf32>
    %94 = vector.shape_cast %93 : vector<96x32xf32> to vector<3x32x32xf32>
    %cst_24 = arith.constant dense<0xFF800000> : vector<3x32xf32>
    %95 = vector.multi_reduction <maximumf>, %94, %cst_24 [1] : vector<3x32x32xf32> to vector<3x32xf32>
    %c40 = arith.constant 40 : index
    %c0_25 = arith.constant 0 : index
    %96 = vector.load %arg1[%c40, %c0_25] : memref<120x128xf32, #tpu.memory_space<vmem>>, vector<32x32xf32>
    %c72 = arith.constant 72 : index
    %c0_26 = arith.constant 0 : index
    %97 = vector.load %arg1[%c72, %c0_26] : memref<120x128xf32, #tpu.memory_space<vmem>>, vector<1x32xf32>
    %cst_27 = arith.constant dense<0.000000e+00> : vector<3x32xf32>
    %98 = tpu.matmul %95, %96, %cst_27 {dimension_numbers = #tpu.dot_dimension_numbers<[1], [0], [0], [1], [0, 0, 1, 1], [], []>} : vector<3x32xf32>, vector<32x32xf32>, vector<3x32xf32> -> vector<3x32xf32>
    %99 = vector.broadcast %97 : vector<1x32xf32> to vector<3x32xf32>
    %100 = arith.addf %98, %99 : vector<3x32xf32>
    %101 = arith.negf %100 : vector<3x32xf32>
    %102 = math.exp %101 : vector<3x32xf32>
    %cst_28 = arith.constant 1.000000e+00 : f32
    %103 = vector.broadcast %cst_28 : f32 to vector<3x32xf32>
    %104 = arith.addf %103, %102 : vector<3x32xf32>
    %105 = arith.divf %103, %104 : vector<3x32xf32>
    %106 = arith.mulf %100, %105 : vector<3x32xf32>
    %c80 = arith.constant 80 : index
    %c0_29 = arith.constant 0 : index
    %107 = vector.load %arg1[%c80, %c0_29] : memref<120x128xf32, #tpu.memory_space<vmem>>, vector<32x128xf32>
    %c112 = arith.constant 112 : index
    %c0_30 = arith.constant 0 : index
    %108 = vector.load %arg1[%c112, %c0_30] : memref<120x128xf32, #tpu.memory_space<vmem>>, vector<1x128xf32>
    %cst_31 = arith.constant dense<0.000000e+00> : vector<3x128xf32>
    %109 = tpu.matmul %106, %107, %cst_31 {dimension_numbers = #tpu.dot_dimension_numbers<[1], [0], [0], [1], [0, 0, 1, 1], [], []>} : vector<3x32xf32>, vector<32x128xf32>, vector<3x128xf32> -> vector<3x128xf32>
    %110 = vector.broadcast %108 : vector<1x128xf32> to vector<3x128xf32>
    %111 = arith.addf %109, %110 : vector<3x128xf32>
    %c0_32 = arith.constant 0 : index
    %c0_33 = arith.constant 0 : index
    %112 = vector.load %arg2[%c0_32, %c0_33] : memref<3x128xf32, #tpu.memory_space<vmem>>, vector<3x128xf32>
    tpu.vector_store %arg2[%c0_32, %c0_33], %111 {strides = array<i32>} : memref<3x128xf32, #tpu.memory_space<vmem>>, vector<3x128xf32>,
    return
  }
}

</mosaic_0001>

<bundles_post_ra>
// kernel: tpu_custom_call.1
= control target key start
LH: loop header
LB: loop body
LE: loop exit
PB: predicated region body
PF: predicated region fallthrough
CT: control target
= control target key end

     0   :  { %7 = vsyncpa [#allocation3], 0  ;;  %s1891_s0 = inlined_call_operand.vmem [shape: f32[3,16,4], index: 0, kind: input, shape index: {}]   ;;  %s1892_s1 = inlined_call_operand.hbm [shape: f32[120,128], index: 1, kind: input, shape index: {}]   ;;  %s1893_s2 = inlined_call_operand.hbm [shape: f32[3,128], index: 2, kind: output, shape index: {}]  }
   0x1   :  { %8 = vsyncpa [#allocation4], 0  ;;  %s1503_s9 = smov [#allocation2]   ;;  %s1455_s13 = scalar_lea.hbm %s1892_s1, 1920 }
   0x2   :  { %s16_s10 = sshll.u32 %s1503_s9, 4  ;;  %p1456_p0 = scmp.ne.s32.totalorder %s1892_s1, %s1455_s13  ;;  %s17_s10 = int_to_ptr.vmem [resolvable:$true] %s16_s10 }
   0x3   :  { %p1459_p1 = scmp.lt.u32.totalorder %s1455_s13, %s1892_s1 }
   0x5   :  { %p1461_p2 = pnand %p1459_p1, %p1456_p0 }
   0x7   :  { %1464 = shalt.err (!%p1461_p2)
}
   0x8   :  { %s1465_s18 = scalar_lea.vmem %s17_s10, 1920  ;;  %p1470_p4 = scmp.lt.s32.totalorder %s17_s10, %s17_s10 }
   0x9   :  { %p1466_p3 = scmp.ne.s32.totalorder %s17_s10, %s1465_s18  ;;  %p1471_p5 = scmp.lt.s32.totalorder %s1465_s18, %s1465_s18 }
   0xb   :  { %p1472_p6 = por %p1471_p5, %p1470_p4 }
   0xd   :  { %p1473_p7 = pnand %p1472_p6, %p1466_p3 }
   0xf   :  { %1476 = shalt.err (!%p1473_p7)
}
  0x10   :  { %s1504_s19 = smov 128   ;;  %s1505_s20 = smov 8  }
  0x11   :  { %22 = dma.hbm_to_vmem [thread:$0]  %s1892_s1, 1920, %s17_s10, [#allocation3], %s1504_s19, %s1504_s19, %s1505_s20  }
  0x12   :  { %1499 = dma.done.wait [#allocation3], 1920  }
  0x13   :  { %1500 = vsyncadd [#allocation3], 4294965376  ;;  %v1506_v0 = vmov 0   ;;  %v27_v1 = vld [vmem:[%s1891_s0 + $0x8] sm:$0xff]  ;;  %v26_v2 = vld [vmem:[%s1891_s0] sm:$0xff]  ;;  %v1507_v3 = vmov 1  }
  0x14   :  { %1367 = vset.pattern.permute.xlu1 %v1506_v0  ;;  %1365 = vset.pattern.permute.xlu0 %v1506_v0  ;;  %v1508_v4 = vmov 2   ;;  %v29_v5 = vld [vmem:[%s1891_s0 + $0x18] sm:$0xff]  ;;  %v28_v6 = vld [vmem:[%s1891_s0 + $0x10] sm:$0xff]  ;;  %v31_v7 = vld [vmem:[%s1891_s0 + $0x28] sm:$0xff]  ;;  %vm215_vm0 = vcmask 130048   ;;  %vm329_vm1 = vcmask 261120  }
  0x15   :  { %43 = vperm.xlu1 %1367, %v27_v1   ;;  %38 = vperm.xlu0 %1365, %v26_v2   ;;  %v30_v8 = vld [vmem:[%s1891_s0 + $0x20] sm:$0xff]  ;;  %v208_v9 = vld [vmem:[#allocation2 + $0x10] sm:$0xff]  ;;  %v209_v10 = vld [vmem:[#allocation2 + $0x18] sm:$0xff]  ;;  %s1512_s0 = smov [#allocation5]  }
  0x16   :  { %v1335_v11 = vpack.c.bf16 %v209_v10, %v208_v9  ;;  %v1562_v14 = vld [vmem:[#allocation2 + $0x1] ss:$0 sm:$0xff]  ;;  %v1568_v17 = vld [vmem:[#allocation2] ss:$0 sm:$0xff]  ;;  %v1574_v20 = vld [vmem:[#allocation2 + $0x2] ss:$0 sm:$0xff] }
  0x17   :  { %v1588_v29 = vld [vmem:[#allocation2 + $0x8] ss:$0 sm:$0xff]  ;;  %s1191_s6 = sshll.u32 %s1512_s0, 4  ;;  %s1192_s6 = int_to_ptr.vmem [resolvable:$true] %s1191_s6 }
  0x18   :  { %1336 = vmatprep.subr.bf16.mxu0 %v1335_v11  ;;  %1340 = vmatprep.subr.bf16.mxu1 %v1335_v11  ;;  %s1477_s7 = scalar_lea.vmem %s1192_s6, 64  ;;  %p1482_p9 = scmp.lt.s32.totalorder %s1192_s6, %s1192_s6 }
  0x19   :  { %1368 = vset.pattern.permute.xlu1 %v1507_v3  ;;  %1366 = vset.pattern.permute.xlu0 %v1507_v3  ;;  %p1478_p8 = scmp.ne.s32.totalorder %s1192_s6, %s1477_s7  ;;  %p1483_p10 = scmp.lt.s32.totalorder %s1477_s7, %s1477_s7 }
  0x1a   :  { %81 = vperm.xlu1 %1368, %v27_v1   ;;  %77 = vperm.xlu0 %1366, %v26_v2  }
  0x1b   :  { %1338 = vmatpush3.bf16.msra.mxu0 %v1335_v11  ;;  %1342 = vmatpush3.bf16.msra.mxu1 %v1335_v11  ;;  %p1484_p11 = por %p1483_p10, %p1482_p9 }
  0x1d   :  { %p1485_p12 = pnand %p1484_p11, %p1478_p8 }
  0x1e   :  { %1369 = vset.pattern.permute.xlu1 %v1508_v4  ;;  %1370 = vset.pattern.permute.xlu0 %v1508_v4 }
  0x1f   :  { %117 = vperm.xlu1 %1369, %v26_v2   ;;  %121 = vperm.xlu0 %1370, %v27_v1  }
  0x23   :  { %1371 = vset.pattern.permute.xlu1 %v1506_v0  ;;  %129 = vperm.xlu0 %1370, %v29_v5  }
  0x24   :  { %48 = vperm.xlu1 %1371, %v28_v6  }
  0x27   :  { %1374 = vset.pattern.permute.xlu0 %v1506_v0 }
  0x28   :  { %1372 = vset.pattern.permute.xlu1 %v1507_v3  ;;  %53 = vperm.xlu0 %1374, %v29_v5  }
  0x29   :  { %85 = vperm.xlu1 %1372, %v28_v6  }
  0x2c   :  { %63 = vperm.xlu0 %1374, %v31_v7  }
  0x2d   :  { %89 = vperm.xlu1 %1372, %v29_v5  }
  0x30   :  { %1378 = vset.pattern.permute.xlu0 %v1508_v4 }
  0x31   :  { %1373 = vset.pattern.permute.xlu1 %v1508_v4  ;;  %137 = vperm.xlu0 %1378, %v31_v7  }
  0x32   :  { %125 = vperm.xlu1 %1373, %v28_v6  }
  0x36   :  { %1375 = vset.pattern.permute.xlu1 %v1506_v0 }
  0x37   :  { %58 = vperm.xlu1 %1375, %v30_v8  }
  0x3b   :  { %1376 = vset.pattern.permute.xlu1 %v1507_v3 }
  0x3c   :  { %93 = vperm.xlu1 %1376, %v30_v8  }
  0x40   :  { %97 = vperm.xlu1 %1376, %v31_v7  }
  0x44   :  { %1377 = vset.pattern.permute.xlu1 %v1508_v4 }
  0x45   :  { %133 = vperm.xlu1 %1377, %v30_v8  }
  0x94   :  { %v1558_v12 = vpop.permute.xlu1 %43  ;;  %v1560_v13 = vpop.permute.xlu0 %38 }
  0x95   :  { %v71_v21 = vmul.f32 %v1568_v17, %v1558_v12  ;;  %v70_v22 = vmul.f32 %v1568_v17, %v1560_v13 }
  0x99   :  { %v1564_v15 = vpop.permute.xlu1 %81  ;;  %v1566_v16 = vpop.permute.xlu0 %77 }
  0x9a   :  { %v105_v18 = vmul.f32 %v1562_v14, %v1564_v15  ;;  %v104_v19 = vmul.f32 %v1562_v14, %v1566_v16 }
  0x9c   :  { %v111_v25 = vadd.f32 %v105_v18, %v71_v21  ;;  %v110_v26 = vadd.f32 %v104_v19, %v70_v22 }
  0x9e   :  { %v1580_v23 = vpop.permute.xlu1 %117  ;;  %v1582_v24 = vpop.permute.xlu0 %121 }
  0x9f   :  { %v144_v27 = vmul.f32 %v1574_v20, %v1580_v23  ;;  %v145_v28 = vmul.f32 %v1574_v20, %v1582_v24 }
  0xa1   :  { %v150_v30 = vadd.f32 %v144_v27, %v110_v26  ;;  %v151_v31 = vadd.f32 %v145_v28, %v111_v25 }
  0xa2   :  { %v1594_v35 = vpop.permute.xlu0 %129 }
  0xa3   :  { %v161_v32 = vadd.f32 %v1588_v29, %v151_v31  ;;  %v1591_v33 = vpop.permute.xlu1 %48  ;;  %v160_v34 = vadd.f32 %v1588_v29, %v150_v30  ;;  %v147_v45 = vmul.f32 %v1574_v20, %v1594_v35 }
  0xa4   :  { %v72_v43 = vmul.f32 %v1568_v17, %v1591_v33 }
  0xa5   :  { %v1205_v36 = vmul.f32 -1.442695, %v161_v32  ;;  %v1204_v37 = vmul.f32 -1.442695, %v160_v34 }
  0xa7   :  { %1379 = vpow2.f32 %v1205_v36  ;;  %v1598_v39 = vpop.permute.xlu0 %53 }
  0xa8   :  { %v1596_v38 = vpop.permute.xlu1 %85  ;;  %1381 = vpow2.f32 %v1204_v37  ;;  %v73_v40 = vmul.f32 %v1568_v17, %v1598_v39 }
  0xa9   :  { %v106_v44 = vmul.f32 %v1562_v14, %v1596_v38 }
  0xab   :  { %v112_v52 = vadd.f32 %v106_v44, %v72_v43  ;;  %v1620_v61 = vpop.permute.xlu0 %63 }
  0xac   :  { %v1602_v41 = vpop.permute.xlu1 %89  ;;  %v75_v6 = vmul.f32 %v1568_v17, %v1620_v61 }
  0xad   :  { %v107_v42 = vmul.f32 %v1562_v14, %v1602_v41 }
  0xaf   :  { %v113_v46 = vadd.f32 %v107_v42, %v73_v40 }
  0xb0   :  { %v1624_v63 = vpop.permute.xlu0 %137 }
  0xb1   :  { %v1380_v47 = vpop.eup %1379  ;;  %v153_v48 = vadd.f32 %v147_v45, %v113_v46  ;;  %v1612_v49 = vpop.permute.xlu1 %125  ;;  %v149_v9 = vmul.f32 %v1574_v20, %v1624_v63 }
  0xb2   :  { %v1382_v50 = vpop.eup %1381  ;;  %v185_v51 = vadd.f32 1.0, %v1380_v47  ;;  %v146_v53 = vmul.f32 %v1574_v20, %v1612_v49 }
  0xb3   :  { %v163_v54 = vadd.f32 %v1588_v29, %v153_v48  ;;  %v184_v55 = vadd.f32 1.0, %v1382_v50 }
  0xb4   :  { %1383 = vrcp.f32 %v185_v51  ;;  %v152_v56 = vadd.f32 %v146_v53, %v112_v52  ;;  %v1650_v52 = vld [vmem:[#allocation2 + $0x20] ss:$0 sm:$0xff] }
  0xb5   :  { %v1207_v57 = vmul.f32 -1.442695, %v163_v54  ;;  %1385 = vrcp.f32 %v184_v55 }
  0xb6   :  { %v162_v58 = vadd.f32 %v1588_v29, %v152_v56  ;;  %v1618_v59 = vpop.permute.xlu1 %58 }
  0xb7   :  { %1387 = vpow2.f32 %v1207_v57  ;;  %v74_v2 = vmul.f32 %v1568_v17, %v1618_v59 }
  0xb8   :  { %v1206_v60 = vmul.f32 -1.442695, %v162_v58 }
  0xba   :  { %1389 = vpow2.f32 %v1206_v60 }
  0xbb   :  { %v1622_v62 = vpop.permute.xlu1 %93 }
  0xbc   :  { %v108_v3 = vmul.f32 %v1562_v14, %v1622_v62 }
  0xbe   :  { %v1384_v0 = vpop.eup %1383  ;;  %v114_v19 = vadd.f32 %v108_v3, %v74_v2 }
  0xbf   :  { %v1386_v1 = vpop.eup %1385  ;;  %v1630_v4 = vpop.permute.xlu1 %97  ;;  %v203_v5 = vmul.f32 %v1384_v0, %v161_v32 }
  0xc0   :  { %v109_v7 = vmul.f32 %v1562_v14, %v1630_v4  ;;  %v202_v8 = vmul.f32 %v1386_v1, %v160_v34  ;;  %v357_v1 = vlaneseq }
  0xc1   :  { %v1388_v10 = vpop.eup %1387 }
  0xc2   :  { %v187_v11 = vadd.f32 1.0, %v1388_v10  ;;  %v115_v18 = vadd.f32 %v109_v7, %v75_v6  ;;  %1282 = vmatprep.mubr.msk.f32.mxu0 %vm215_vm0, %v202_v8 }
  0xc3   :  { %1283 = vmatmul.mubr.msk.f32.vlgmr.msra.gmra.mrb[0].mxu0 %vm215_vm0, %v203_v5  ;;  %v1656_v5 = vshrl.u32 %v357_v1, 7 }
  0xc4   :  { %v1390_v21 = vpop.eup %1389  ;;  %v155_v22 = vadd.f32 %v149_v9, %v115_v18  ;;  %v1640_v25 = vpop.permute.xlu1 %133  ;;  %1391 = vrcp.f32 %v187_v11 }
  0xc5   :  { %v186_v26 = vadd.f32 1.0, %v1390_v21  ;;  %v148_v27 = vmul.f32 %v1574_v20, %v1640_v25  ;;  %v1659_v8 = vadd.s32 8, %v1656_v5 }
  0xc6   :  { %v165_v28 = vadd.f32 %v1588_v29, %v155_v22 }
  0xc7   :  { %1393 = vrcp.f32 %v186_v26  ;;  %v154_v30 = vadd.f32 %v148_v27, %v114_v19 }
  0xc8   :  { %v1209_v31 = vmul.f32 -1.442695, %v165_v28 }
  0xc9   :  { %v164_v32 = vadd.f32 %v1588_v29, %v154_v30 }
  0xca   :  { %1395 = vpow2.f32 %v1209_v31 }
  0xcb   :  { %v1208_v34 = vmul.f32 -1.442695, %v164_v32 }
  0xcd   :  { %1397 = vpow2.f32 %v1208_v34 }
  0xce   :  { %v1392_v36 = vpop.eup %1391 }
  0xcf   :  { %v205_v42 = vmul.f32 %v1392_v36, %v163_v54 }
  0xd1   :  { %v1394_v37 = vpop.eup %1393 }
  0xd2   :  { %v204_v40 = vmul.f32 %v1394_v37, %v162_v58 }
  0xd4   :  { %v1396_v43 = vpop.eup %1395  ;;  %1285 = vmatprep.mubr.msk.f32.mxu0 %vm215_vm0, %v204_v40 }
  0xd5   :  { %v189_v44 = vadd.f32 1.0, %v1396_v43  ;;  %1286 = vmatmul.mubr.msk.f32.gmra.mrb[2].mxu0 %vm215_vm0, %v205_v42 }
  0xd7   :  { %v1398_v45 = vpop.eup %1397  ;;  %1399 = vrcp.f32 %v189_v44 }
  0xd8   :  { %v188_v46 = vadd.f32 1.0, %v1398_v45 }
  0xda   :  { %1401 = vrcp.f32 %v188_v46 }
  0xe1   :  { %v1400_v47 = vpop.eup %1399 }
  0xe2   :  { %v207_v51 = vmul.f32 %v1400_v47, %v165_v28 }
  0xe4   :  { %v1402_v48 = vpop.eup %1401 }
  0xe5   :  { %v206_v50 = vmul.f32 %v1402_v48, %v164_v32 }
  0xe7   :  { %1288 = vmatprep.mubr.msk.f32.mxu0 %vm215_vm0, %v206_v50 }
  0xe8   :  { %1289 = vmatmul.mubr.msk.f32.gmra.mrb[4].mxu0 %vm215_vm0, %v207_v51 }
 0x196   :  { %v1284_v53 = vpop.f32.mrb[0].mxu0 }
 0x197   :  { %v306_v54 = vadd.f32 %v1284_v53, %v1650_v52  ;;  %v300_v55 = vpop.f32.mrb[1].mxu0 }
 0x198   :  { %v301_v56 = vadd.f32 %v1650_v52, %v300_v55 }
 0x199   :  { %v331_v57 = vsel %vm329_vm1, %v306_v54, -inf }
 0x19a   :  { %v330_v58 = vsel %vm329_vm1, %v301_v56, -inf }
 0x19b   :  { %v332_v60 = vmax.f32 %v330_v58, %v331_v57 }
 0x19d   :  { %v333_v0 = vrot.slane %v332_v60, 4 }
 0x19f   :  { %v334_v2 = vmax.f32 %v332_v60, %v333_v0 }
 0x1a1   :  { %v335_v3 = vrot.slane %v334_v2, 2 }
 0x1a3   :  { %v336_v6 = vmax.f32 %v334_v2, %v335_v3 }
 0x1a5   :  { %v337_v7 = vrot.slane %v336_v6, 1 }
 0x1a7   :  { %v338_v9 = vmax.f32 %v336_v6, %v337_v7 }
 0x1a8   :  { %v1287_v10 = vpop.f32.mrb[2].mxu0 }
 0x1a9   :  { %vm360_vm2 = vcmp.eq.f32.partialorder %v301_v56, %v338_v9  ;;  %vm361_vm3 = vcmp.eq.f32.partialorder %v306_v54, %v338_v9  ;;  %v316_v11 = vadd.f32 %v1287_v10, %v1650_v52  ;;  %v310_v18 = vpop.f32.mrb[3].mxu0 }
 0x1aa   :  { %v366_v19 = vsel %vm360_vm2, %v1656_v5, 16  ;;  %v367_v21 = vsel %vm361_vm3, %v1659_v8, 16  ;;  %v311_v22 = vadd.f32 %v1650_v52, %v310_v18 }
 0x1ab   :  { %v372_v26 = vsel %vm329_vm1, %v366_v19, 2147483647  ;;  %v373_v27 = vsel %vm329_vm1, %v367_v21, 2147483647  ;;  %v340_v28 = vsel %vm329_vm1, %v316_v11, -inf }
 0x1ac   :  { %vm374_vm4 = vcmp.lt.s32.totalorder %v372_v26, %v373_v27  ;;  %v339_v30 = vsel %vm329_vm1, %v311_v22, -inf }
 0x1ad   :  { %v375_v31 = vsel %vm374_vm4, %v372_v26, %v373_v27  ;;  %v341_v32 = vmax.f32 %v339_v30, %v340_v28 }
 0x1ae   :  { %v376_v34 = vrot.slane %v375_v31, 4 }
 0x1af   :  { %v342_v36 = vrot.slane %v341_v32, 4 }
 0x1b0   :  { %vm377_vm5 = vcmp.lt.s32.totalorder %v375_v31, %v376_v34 }
 0x1b1   :  { %v378_v37 = vsel %vm377_vm5, %v375_v31, %v376_v34  ;;  %v343_v40 = vmax.f32 %v341_v32, %v342_v36 }
 0x1b2   :  { %v379_v42 = vrot.slane %v378_v37, 2 }
 0x1b3   :  { %v344_v43 = vrot.slane %v343_v40, 2 }
 0x1b4   :  { %vm380_vm6 = vcmp.lt.s32.totalorder %v378_v37, %v379_v42 }
 0x1b5   :  { %v381_v44 = vsel %vm380_vm6, %v378_v37, %v379_v42  ;;  %v345_v45 = vmax.f32 %v343_v40, %v344_v43 }
 0x1b6   :  { %v382_v46 = vrot.slane %v381_v44, 1 }
 0x1b7   :  { %v346_v47 = vrot.slane %v345_v45, 1 }
 0x1b8   :  { %vm383_vm7 = vcmp.lt.s32.totalorder %v381_v44, %v382_v46 }
 0x1b9   :  { %v384_v48 = vsel %vm383_vm7, %v381_v44, %v382_v46  ;;  %v347_v50 = vmax.f32 %v345_v45, %v346_v47 }
 0x1ba   :  { %vm411_vm8 = vcmp.eq.s32.totalorder %v1656_v5, %v384_v48  ;;  %vm412_vm9 = vcmp.eq.s32.totalorder %v1659_v8, %v384_v48 }
 0x1bb   :  { %vm362_vm10 = vcmp.eq.f32.partialorder %v311_v22, %v347_v50  ;;  %vm363_vm11 = vcmp.eq.f32.partialorder %v316_v11, %v347_v50  ;;  %v1290_v51 = vpop.f32.mrb[4].mxu0  ;;  %v417_v53 = vsel %vm411_vm8, %v1560_v13, 0.0  ;;  %v418_v54 = vsel %vm412_vm9, %v1558_v12, 0.0 }
 0x1bc   :  { %v368_v55 = vsel %vm362_vm10, %v1656_v5, 16  ;;  %v369_v56 = vsel %vm363_vm11, %v1659_v8, 16  ;;  %v1680_v57 = vadd.f32 %v1290_v51, %v1650_v52  ;;  %v320_v58 = vpop.f32.mrb[5].mxu0  ;;  %v423_v60 = vsel %vm329_vm1, %v417_v53, 0.0 }
 0x1bd   :  { %v385_v0 = vsel %vm329_vm1, %v368_v55, 2147483647  ;;  %v386_v1 = vsel %vm329_vm1, %v369_v56, 2147483647  ;;  %v321_v13 = vadd.f32 %v1650_v52, %v320_v58  ;;  %v424_v2 = vsel %vm329_vm1, %v418_v54, 0.0 }
 0x1be   :  { %vm387_vm12 = vcmp.lt.s32.totalorder %v385_v0, %v386_v1  ;;  %v349_v12 = vsel %vm329_vm1, %v1680_v57, -inf  ;;  %v425_v3 = vadd.f32 %v424_v2, %v423_v60  ;;  %v483_v6 = vsel %vm411_vm8, %v1580_v23, 0.0 }
 0x1bf   :  { %v388_v7 = vsel %vm387_vm12, %v385_v0, %v386_v1  ;;  %v348_v9 = vsel %vm329_vm1, %v321_v13, -inf  ;;  %v484_v10 = vsel %vm412_vm9, %v1582_v24, 0.0  ;;  %v489_v11 = vsel %vm329_vm1, %v483_v6, 0.0 }
 0x1c0   :  { %v389_v18 = vrot.slane %v388_v7, 4  ;;  %v350_v19 = vmax.f32 %v348_v9, %v349_v12  ;;  %v426_v21 = vrot.slane %v425_v3, 4  ;;  %v490_v22 = vsel %vm329_vm1, %v484_v10, 0.0 }
 0x1c1   :  { %v491_v26 = vadd.f32 %v490_v22, %v489_v11  ;;  %v450_v27 = vsel %vm411_vm8, %v1566_v16, 0.0  ;;  %v451_v23 = vsel %vm412_vm9, %v1564_v15, 0.0  ;;  %vm1510_vm12 = vmmov 0  }
 0x1c2   :  { %vm390_vm13 = vcmp.lt.s32.totalorder %v388_v7, %v389_v18  ;;  %v351_v28 = vrot.slane %v350_v19, 4  ;;  %v427_v30 = vadd.f32 %v426_v21, %v425_v3  ;;  %v456_v24 = vsel %vm329_vm1, %v450_v27, 0.0 }
 0x1c3   :  { %v391_v31 = vsel %vm390_vm13, %v388_v7, %v389_v18  ;;  %v492_v32 = vrot.slane %v491_v26, 4  ;;  %v457_v34 = vsel %vm329_vm1, %v451_v23, 0.0  ;;  %vm1021_vm13 = vcmask 1042434  }
 0x1c4   :  { %v392_v36 = vrot.slane %v391_v31, 2  ;;  %v352_v37 = vmax.f32 %v350_v19, %v351_v28  ;;  %v428_v40 = vrot.slane %v427_v30, 2  ;;  %v458_v42 = vadd.f32 %v457_v34, %v456_v24 }
 0x1c5   :  { %v493_v43 = vadd.f32 %v492_v32, %v491_v26 }
 0x1c6   :  { %vm393_vm14 = vcmp.lt.s32.totalorder %v391_v31, %v392_v36  ;;  %v353_v16 = vrot.slane %v352_v37, 2  ;;  %v429_v44 = vadd.f32 %v428_v40, %v427_v30  ;;  %v459_v45 = vrot.slane %v458_v42, 4 }
 0x1c7   :  { %v394_v46 = vsel %vm393_vm14, %v391_v31, %v392_v36  ;;  %v494_v15 = vrot.slane %v493_v43, 2 }
 0x1c8   :  { %v395_v47 = vrot.slane %v394_v46, 1  ;;  %v354_v48 = vmax.f32 %v352_v37, %v353_v16  ;;  %v430_v50 = vrot.slane %v429_v44, 1  ;;  %v460_v51 = vadd.f32 %v459_v45, %v458_v42 }
 0x1c9   :  { %v495_v53 = vadd.f32 %v494_v15, %v493_v43 }
 0x1ca   :  { %vm396_vm15 = vcmp.lt.s32.totalorder %v394_v46, %v395_v47  ;;  %v355_v54 = vrot.slane %v354_v48, 1  ;;  %v431_v55 = vadd.f32 %v430_v50, %v429_v44  ;;  %v461_v56 = vrot.slane %v460_v51, 2 }
 0x1cb   :  { %v397_v58 = vsel %vm396_vm15, %v394_v46, %v395_v47  ;;  %v496_v60 = vrot.slane %v495_v53, 1 }
 0x1cc   :  { %vm413_vm2 = vcmp.eq.s32.totalorder %v1656_v5, %v397_v58  ;;  %vm414_vm3 = vcmp.eq.s32.totalorder %v1659_v8, %v397_v58  ;;  %v356_v0 = vmax.f32 %v354_v48, %v355_v54  ;;  %521 = vbcast.lane.b32.xlu0 %v431_v55, 264  ;;  %517 = vbcast.lane.b32.xlu1 %v431_v55, 256 }
 0x1cd   :  { %v1708_v1 = vadd.f32 %v496_v60, %v495_v53  ;;  %v462_v2 = vadd.f32 %v461_v56, %v460_v51  ;;  %v419_v12 = vsel %vm413_vm2, %v1591_v33, 0.0  ;;  %v420_v3 = vsel %vm414_vm3, %v1598_v39, 0.0 }
 0x1ce   :  { %vm364_vm4 = vcmp.eq.f32.partialorder %v321_v13, %v356_v0  ;;  %vm365_vm5 = vcmp.eq.f32.partialorder %v1680_v57, %v356_v0  ;;  %v432_v6 = vsel %vm329_vm1, %v419_v12, 0.0  ;;  %v433_v7 = vsel %vm329_vm1, %v420_v3, 0.0 }
 0x1cf   :  { %v370_v9 = vsel %vm364_vm4, %v1656_v5, 16  ;;  %v371_v10 = vsel %vm365_vm5, %v1659_v8, 16  ;;  %v463_v11 = vrot.slane %v462_v2, 1  ;;  %v434_v18 = vadd.f32 %v433_v7, %v432_v6 }
 0x1d0   :  { %v398_v19 = vsel %vm329_vm1, %v370_v9, 2147483647  ;;  %v399_v33 = vsel %vm329_vm1, %v371_v10, 2147483647  ;;  %607 = vbcast.lane.b32.xlu0 %v1708_v1, 256  ;;  %v452_v39 = vsel %vm413_vm2, %v1596_v38, 0.0 }
 0x1d1   :  { %vm400_vm6 = vcmp.lt.s32.totalorder %v398_v19, %v399_v33  ;;  %v464_v57 = vadd.f32 %v463_v11, %v462_v2  ;;  %v435_v13 = vrot.slane %v434_v18, 4  ;;  %v453_v21 = vsel %vm414_vm3, %v1602_v41, 0.0 }
 0x1d2   :  { %v401_v22 = vsel %vm400_vm6, %v398_v19, %v399_v33  ;;  %v465_v26 = vsel %vm329_vm1, %v452_v39, 0.0  ;;  %v466_v27 = vsel %vm329_vm1, %v453_v21, 0.0  ;;  %v485_v23 = vsel %vm413_vm2, %v1612_v49, 0.0 }
 0x1d3   :  { %v402_v28 = vrot.slane %v401_v22, 4  ;;  %562 = vbcast.lane.b32.xlu1 %v464_v57, 256  ;;  %v436_v30 = vadd.f32 %v435_v13, %v434_v18  ;;  %v467_v38 = vadd.f32 %v466_v27, %v465_v26  ;;  %v486_v24 = vsel %vm414_vm3, %v1594_v35, 0.0 }
 0x1d4   :  { %525 = vbcast.lane.b32.xlu0 %v431_v55, 272  ;;  %v498_v41 = vsel %vm329_vm1, %v485_v23, 0.0  ;;  %v499_v31 = vsel %vm329_vm1, %v486_v24, 0.0 }
 0x1d5   :  { %vm403_vm7 = vcmp.lt.s32.totalorder %v401_v22, %v402_v28  ;;  %v437_v32 = vrot.slane %v436_v30, 2  ;;  %v468_v34 = vrot.slane %v467_v38, 4  ;;  %v500_v36 = vadd.f32 %v499_v31, %v498_v41 }
 0x1d6   :  { %v404_v37 = vsel %vm403_vm7, %v401_v22, %v402_v28 }
 0x1d7   :  { %v405_v40 = vrot.slane %v404_v37, 2  ;;  %566 = vbcast.lane.b32.xlu1 %v464_v57, 264  ;;  %v438_v49 = vadd.f32 %v437_v32, %v436_v30  ;;  %v501_v42 = vrot.slane %v500_v36, 4  ;;  %v469_v16 = vadd.f32 %v468_v34, %v467_v38 }
 0x1d8   :  { %529 = vbcast.lane.b32.xlu0 %v431_v55, 280 }
 0x1d9   :  { %vm406_vm8 = vcmp.lt.s32.totalorder %v404_v37, %v405_v40  ;;  %v439_v43 = vrot.slane %v438_v49, 1  ;;  %v502_v44 = vadd.f32 %v501_v42, %v500_v36  ;;  %v470_v47 = vrot.slane %v469_v16, 2 }
 0x1da   :  { %v407_v35 = vsel %vm406_vm8, %v404_v37, %v405_v40 }
 0x1db   :  { %v408_v45 = vrot.slane %v407_v35, 1  ;;  %611 = vbcast.lane.b32.xlu1 %v1708_v1, 264  ;;  %v503_v46 = vrot.slane %v502_v44, 2  ;;  %v440_v15 = vadd.f32 %v439_v43, %v438_v49  ;;  %v471_v54 = vadd.f32 %v470_v47, %v469_v16 }
 0x1dc   :  { %615 = vbcast.lane.b32.xlu0 %v1708_v1, 272 }
 0x1dd   :  { %vm409_vm9 = vcmp.lt.s32.totalorder %v407_v35, %v408_v45  ;;  %v504_v48 = vadd.f32 %v503_v46, %v502_v44  ;;  %v472_v3 = vrot.slane %v471_v54, 1 }
 0x1de   :  { %v410_v50 = vsel %vm409_vm9, %v407_v35, %v408_v45 }
 0x1df   :  { %vm415_vm10 = vcmp.eq.s32.totalorder %v1656_v5, %v410_v50  ;;  %vm416_vm11 = vcmp.eq.s32.totalorder %v1659_v8, %v410_v50  ;;  %570 = vbcast.lane.b32.xlu1 %v464_v57, 272  ;;  %v505_v55 = vrot.slane %v504_v48, 1 }
 0x1e0   :  { %532 = vbcast.lane.b32.xlu0 %v440_v15, 256  ;;  %v421_v51 = vsel %vm415_vm10, %v1618_v59, 0.0  ;;  %v422_v53 = vsel %vm416_vm11, %v1620_v61, 0.0  ;;  %v487_v0 = vsel %vm415_vm10, %v1640_v25, 0.0  ;;  %v488_v2 = vsel %vm416_vm11, %v1624_v63, 0.0 }
 0x1e1   :  { %v441_v56 = vsel %vm329_vm1, %v421_v51, 0.0  ;;  %v442_v58 = vsel %vm329_vm1, %v422_v53, 0.0  ;;  %v454_v5 = vsel %vm415_vm10, %v1622_v62, 0.0  ;;  %v455_v8 = vsel %vm416_vm11, %v1630_v4, 0.0 }
 0x1e2   :  { %v443_v60 = vadd.f32 %v442_v58, %v441_v56  ;;  %v507_v59 = vsel %vm329_vm1, %v487_v0, 0.0  ;;  %v508_v61 = vsel %vm329_vm1, %v488_v2, 0.0  ;;  %v506_v6 = vadd.f32 %v505_v55, %v504_v48 }
 0x1e3   :  { %574 = vbcast.lane.b32.xlu1 %v464_v57, 280  ;;  %v474_v9 = vsel %vm329_vm1, %v454_v5, 0.0  ;;  %v475_v25 = vsel %vm329_vm1, %v455_v8, 0.0  ;;  %v509_v10 = vadd.f32 %v508_v61, %v507_v59  ;;  %v473_v62 = vadd.f32 %v472_v3, %v471_v54 }
 0x1e4   :  { %536 = vbcast.lane.b32.xlu0 %v440_v15, 264  ;;  %v444_v12 = vrot.slane %v443_v60, 4  ;;  %v476_v63 = vadd.f32 %v475_v25, %v474_v9 }
 0x1e5   :  { %v510_v11 = vrot.slane %v509_v10, 4 }
 0x1e6   :  { %v445_v7 = vadd.f32 %v444_v12, %v443_v60  ;;  %v477_v18 = vrot.slane %v476_v63, 4 }
 0x1e7   :  { %619 = vbcast.lane.b32.xlu1 %v1708_v1, 280  ;;  %v511_v33 = vadd.f32 %v510_v11, %v509_v10 }
 0x1e8   :  { %622 = vbcast.lane.b32.xlu0 %v506_v6, 256  ;;  %v446_v4 = vrot.slane %v445_v7, 2  ;;  %v478_v39 = vadd.f32 %v477_v18, %v476_v63 }
 0x1e9   :  { %v512_v13 = vrot.slane %v511_v33, 2 }
 0x1ea   :  { %v447_v19 = vadd.f32 %v446_v4, %v445_v7  ;;  %v479_v21 = vrot.slane %v478_v39, 2 }
 0x1eb   :  { %577 = vbcast.lane.b32.xlu1 %v473_v62, 256  ;;  %v513_v1 = vadd.f32 %v512_v13, %v511_v33 }
 0x1ec   :  { %540 = vbcast.lane.b32.xlu0 %v440_v15, 272  ;;  %v448_v57 = vrot.slane %v447_v19, 1  ;;  %v480_v26 = vadd.f32 %v479_v21, %v478_v39 }
 0x1ed   :  { %v514_v27 = vrot.slane %v513_v1, 1 }
 0x1ee   :  { %v449_v22 = vadd.f32 %v448_v57, %v447_v19  ;;  %v481_v23 = vrot.slane %v480_v26, 1 }
 0x1ef   :  { %581 = vbcast.lane.b32.xlu1 %v473_v62, 264  ;;  %v515_v28 = vadd.f32 %v514_v27, %v513_v1 }
 0x1f0   :  { %544 = vbcast.lane.b32.xlu0 %v440_v15, 280  ;;  %v482_v30 = vadd.f32 %v481_v23, %v480_v26 }
 0x1f3   :  { %626 = vbcast.lane.b32.xlu1 %v506_v6, 264 }
 0x1f4   :  { %630 = vbcast.lane.b32.xlu0 %v506_v6, 272 }
 0x1f7   :  { %585 = vbcast.lane.b32.xlu1 %v473_v62, 272 }
 0x1f8   :  { %547 = vbcast.lane.b32.xlu0 %v449_v22, 256 }
 0x1fb   :  { %589 = vbcast.lane.b32.xlu1 %v473_v62, 280 }
 0x1fc   :  { %551 = vbcast.lane.b32.xlu0 %v449_v22, 264 }
 0x1ff   :  { %634 = vbcast.lane.b32.xlu1 %v506_v6, 280 }
 0x200   :  { %637 = vbcast.lane.b32.xlu0 %v515_v28, 256 }
 0x203   :  { %592 = vbcast.lane.b32.xlu1 %v482_v30, 256 }
 0x204   :  { %555 = vbcast.lane.b32.xlu0 %v449_v22, 272 }
 0x207   :  { %596 = vbcast.lane.b32.xlu1 %v482_v30, 264 }
 0x208   :  { %559 = vbcast.lane.b32.xlu0 %v449_v22, 280 }
 0x20b   :  { %641 = vbcast.lane.b32.xlu1 %v515_v28, 264 }
 0x20c   :  { %645 = vbcast.lane.b32.xlu0 %v515_v28, 272 }
 0x20f   :  { %600 = vbcast.lane.b32.xlu1 %v482_v30, 272 }
 0x213   :  { %604 = vbcast.lane.b32.xlu1 %v482_v30, 280 }
 0x217   :  { %649 = vbcast.lane.b32.xlu1 %v515_v28, 280 }
 0x23e   :  { %v522_v38 = vpop.permute.xlu0 %521  ;;  %v518_v24 = vpop.permute.xlu1 %517 }
 0x23f   :  { %v651_v32 = vmul.f32 %v1568_v17, %v518_v24  ;;  %v652_v44 = vmul.f32 %v1568_v17, %v522_v38 }
 0x242   :  { %v608_v41 = vpop.permute.xlu0 %607 }
 0x243   :  { %v687_v40 = vmul.f32 %v1574_v20, %v608_v41 }
 0x245   :  { %v563_v31 = vpop.permute.xlu1 %562 }
 0x246   :  { %v663_v34 = vmul.f32 %v1562_v14, %v563_v31  ;;  %v526_v36 = vpop.permute.xlu0 %525 }
 0x247   :  { %v653_v53 = vmul.f32 %v1568_v17, %v526_v36 }
 0x248   :  { %v675_v37 = vadd.f32 %v663_v34, %v651_v32 }
 0x249   :  { %v567_v49 = vpop.permute.xlu1 %566 }
 0x24a   :  { %v699_v42 = vadd.f32 %v687_v40, %v675_v37  ;;  %v664_v43 = vmul.f32 %v1562_v14, %v567_v49  ;;  %v530_v16 = vpop.permute.xlu0 %529 }
 0x24b   :  { %v654_v61 = vmul.f32 %v1568_v17, %v530_v16 }
 0x24c   :  { %v711_v35 = vadd.f32 %v1588_v29, %v699_v42  ;;  %v676_v46 = vadd.f32 %v664_v43, %v652_v44 }
 0x24d   :  { %v612_v45 = vpop.permute.xlu1 %611 }
 0x24e   :  { %v688_v15 = vmul.f32 %v1574_v20, %v612_v45  ;;  %v616_v47 = vpop.permute.xlu0 %615  ;;  %v1217_v48 = vmul.f32 -1.442695, %v711_v35 }
 0x24f   :  { %v689_v0 = vmul.f32 %v1574_v20, %v616_v47 }
 0x250   :  { %v700_v50 = vadd.f32 %v688_v15, %v676_v46  ;;  %1403 = vpow2.f32 %v1217_v48 }
 0x251   :  { %v571_v51 = vpop.permute.xlu1 %570 }
 0x252   :  { %v1766_v54 = vadd.f32 %v1588_v29, %v700_v50  ;;  %v665_v55 = vmul.f32 %v1562_v14, %v571_v51  ;;  %v533_v56 = vpop.permute.xlu0 %532 }
 0x253   :  { %v655_v11 = vmul.f32 %v1568_v17, %v533_v56 }
 0x254   :  { %v1218_v58 = vmul.f32 -1.442695, %v1766_v54  ;;  %v677_v60 = vadd.f32 %v665_v55, %v653_v53 }
 0x255   :  { %v575_v2 = vpop.permute.xlu1 %574 }
 0x256   :  { %1405 = vpow2.f32 %v1218_v58  ;;  %v701_v5 = vadd.f32 %v689_v0, %v677_v60  ;;  %v666_v8 = vmul.f32 %v1562_v14, %v575_v2  ;;  %v537_v59 = vpop.permute.xlu0 %536 }
 0x257   :  { %v656_v28 = vmul.f32 %v1568_v17, %v537_v59 }
 0x258   :  { %v1774_v12 = vadd.f32 %v1588_v29, %v701_v5  ;;  %v678_v9 = vadd.f32 %v666_v8, %v654_v61 }
 0x259   :  { %v620_v3 = vpop.permute.xlu1 %619 }
 0x25a   :  { %v1404_v6 = vpop.eup %1403  ;;  %v1219_v7 = vmul.f32 -1.442695, %v1774_v12  ;;  %v690_v25 = vmul.f32 %v1574_v20, %v620_v3  ;;  %v623_v10 = vpop.permute.xlu0 %622 }
 0x25b   :  { %v759_v62 = vadd.f32 1.0, %v1404_v6  ;;  %v691_v21 = vmul.f32 %v1574_v20, %v623_v10 }
 0x25c   :  { %1407 = vpow2.f32 %v1219_v7  ;;  %v702_v63 = vadd.f32 %v690_v25, %v678_v9 }
 0x25d   :  { %v578_v4 = vpop.permute.xlu1 %577  ;;  %1409 = vrcp.f32 %v759_v62 }
 0x25e   :  { %v1780_v18 = vadd.f32 %v1588_v29, %v702_v63  ;;  %v667_v19 = vmul.f32 %v1562_v14, %v578_v4  ;;  %v541_v33 = vpop.permute.xlu0 %540 }
 0x25f   :  { %v657_v43 = vmul.f32 %v1568_v17, %v541_v33 }
 0x260   :  { %v1406_v39 = vpop.eup %1405  ;;  %v1220_v57 = vmul.f32 -1.442695, %v1780_v18  ;;  %v679_v13 = vadd.f32 %v667_v19, %v655_v11 }
 0x261   :  { %v760_v22 = vadd.f32 1.0, %v1406_v39  ;;  %v582_v1 = vpop.permute.xlu1 %581 }
 0x262   :  { %1411 = vpow2.f32 %v1220_v57  ;;  %v703_v26 = vadd.f32 %v691_v21, %v679_v13  ;;  %v668_v27 = vmul.f32 %v1562_v14, %v582_v1  ;;  %v545_v23 = vpop.permute.xlu0 %544 }
 0x263   :  { %1413 = vrcp.f32 %v760_v22  ;;  %v658_v60 = vmul.f32 %v1568_v17, %v545_v23 }
 0x264   :  { %v1788_v30 = vadd.f32 %v1588_v29, %v703_v26  ;;  %v680_v31 = vadd.f32 %v668_v27, %v656_v28 }
 0x265   :  { %v627_v38 = vpop.permute.xlu1 %626 }
 0x266   :  { %v1408_v24 = vpop.eup %1407  ;;  %v1221_v41 = vmul.f32 -1.442695, %v1788_v30  ;;  %v692_v32 = vmul.f32 %v1574_v20, %v627_v38  ;;  %v631_v34 = vpop.permute.xlu0 %630 }
 0x267   :  { %v1410_v36 = vpop.eup %1409  ;;  %v761_v37 = vadd.f32 1.0, %v1408_v24  ;;  %v693_v48 = vmul.f32 %v1574_v20, %v631_v34 }
 0x268   :  { %1415 = vpow2.f32 %v1221_v41  ;;  %v704_v40 = vadd.f32 %v692_v32, %v680_v31  ;;  %v795_v49 = vmul.f32 %v1410_v36, %v711_v35 }
 0x269   :  { %1417 = vrcp.f32 %v761_v37  ;;  %v586_v42 = vpop.permute.xlu1 %585 }
 0x26a   :  { %v1794_v16 = vadd.f32 %v1588_v29, %v704_v40  ;;  %v669_v44 = vmul.f32 %v1562_v14, %v586_v42  ;;  %1295 = vmatprep.mubr.msk.f32.mxu1 %vm215_vm0, %v795_v49  ;;  %v548_v45 = vpop.permute.xlu0 %547 }
 0x26b   :  { %v659_v10 = vmul.f32 %v1568_v17, %v548_v45 }
 0x26c   :  { %v1412_v46 = vpop.eup %1411  ;;  %v1222_v15 = vmul.f32 -1.442695, %v1794_v16  ;;  %v681_v47 = vadd.f32 %v669_v44, %v657_v43 }
 0x26d   :  { %v1414_v50 = vpop.eup %1413  ;;  %v762_v35 = vadd.f32 1.0, %v1412_v46  ;;  %v590_v51 = vpop.permute.xlu1 %589 }
 0x26e   :  { %v796_v53 = vmul.f32 %v1414_v50, %v1766_v54  ;;  %1419 = vpow2.f32 %v1222_v15  ;;  %v705_v55 = vadd.f32 %v693_v48, %v681_v47  ;;  %v670_v56 = vmul.f32 %v1562_v14, %v590_v51  ;;  %v552_v58 = vpop.permute.xlu0 %551 }
 0x26f   :  { %1421 = vrcp.f32 %v762_v35  ;;  %v660_v27 = vmul.f32 %v1568_v17, %v552_v58 }
 0x270   :  { %v1804_v0 = vadd.f32 %v1588_v29, %v705_v55  ;;  %1296 = vmatmul.mubr.msk.f32.vlgmr.msra.gmra.mrb[0].mxu1 %vm215_vm0, %v796_v53  ;;  %v682_v59 = vadd.f32 %v670_v56, %v658_v60 }
 0x271   :  { %v635_v2 = vpop.permute.xlu1 %634 }
 0x272   :  { %v1416_v5 = vpop.eup %1415  ;;  %v1223_v8 = vmul.f32 -1.442695, %v1804_v0  ;;  %v694_v54 = vmul.f32 %v1574_v20, %v635_v2  ;;  %v638_v61 = vpop.permute.xlu0 %637 }
 0x273   :  { %v1418_v3 = vpop.eup %1417  ;;  %v763_v6 = vadd.f32 1.0, %v1416_v5 }
 0x274   :  { %v797_v7 = vmul.f32 %v1418_v3, %v1774_v12  ;;  %1423 = vpow2.f32 %v1223_v8  ;;  %v706_v9 = vadd.f32 %v694_v54, %v682_v59  ;;  %v695_v12 = vmul.f32 %v1574_v20, %v638_v61 }
 0x275   :  { %1425 = vrcp.f32 %v763_v6  ;;  %v593_v25 = vpop.permute.xlu1 %592 }
 0x276   :  { %v1812_v62 = vadd.f32 %v1588_v29, %v706_v9  ;;  %v671_v63 = vmul.f32 %v1562_v14, %v593_v25  ;;  %1298 = vmatprep.mubr.msk.f32.mxu1 %vm215_vm0, %v797_v7  ;;  %v556_v4 = vpop.permute.xlu0 %555 }
 0x277   :  { %v661_v49 = vmul.f32 %v1568_v17, %v556_v4 }
 0x278   :  { %v1420_v11 = vpop.eup %1419  ;;  %v1224_v19 = vmul.f32 -1.442695, %v1812_v62  ;;  %v683_v33 = vadd.f32 %v671_v63, %v659_v10 }
 0x279   :  { %v1422_v39 = vpop.eup %1421  ;;  %v764_v57 = vadd.f32 1.0, %v1420_v11  ;;  %v597_v13 = vpop.permute.xlu1 %596 }
 0x27a   :  { %v798_v21 = vmul.f32 %v1422_v39, %v1780_v18  ;;  %1427 = vpow2.f32 %v1224_v19  ;;  %v707_v22 = vadd.f32 %v695_v12, %v683_v33  ;;  %v672_v1 = vmul.f32 %v1562_v14, %v597_v13  ;;  %v560_v26 = vpop.permute.xlu0 %559  ;;  %v1007_v12 = vld [vmem:[#allocation2 + $0x28] sm:$0xff]  ;;  %v1008_v39 = vld [vmem:[#allocation2 + $0x30] sm:$0xff] }
 0x27b   :  { %1429 = vrcp.f32 %v764_v57  ;;  %v662_v53 = vmul.f32 %v1568_v17, %v560_v26  ;;  %v1344_v57 = vpack.c.bf16 %v1008_v39, %v1007_v12  ;;  %v1509_v13 = vmov 0.0|0.0  }
 0x27c   :  { %v719_v23 = vadd.f32 %v1588_v29, %v707_v22  ;;  %1299 = vmatmul.mubr.msk.f32.gmra.mrb[2].mxu1 %vm215_vm0, %v798_v21  ;;  %v684_v41 = vadd.f32 %v672_v1, %v660_v27  ;;  %1343 = vmatprep.subr.bf16.mxu0 %v1509_v13  ;;  %v1009_v21 = vld [vmem:[#allocation2 + $0x38] sm:$0xff]  ;;  %v1010_v22 = vld [vmem:[#allocation2 + $0x40] sm:$0xff]  ;;  %v1511_v26 = vmov 0.0  }
 0x27d   :  { %v642_v28 = vpop.permute.xlu1 %641  ;;  %1345 = vmatpush3.bf16.msra.mxu0 %v1344_v57  ;;  %v1347_v1 = vpack.c.bf16 %v1010_v22, %v1009_v21  ;;  %1321 = vmatprep.mubr.msk.f32.mxu0 %vm1510_vm12, %v1511_v26 }
 0x27e   :  { %v1424_v38 = vpop.eup %1423  ;;  %v1225_v24 = vmul.f32 -1.442695, %v719_v23  ;;  %v696_v31 = vmul.f32 %v1574_v20, %v642_v28  ;;  %v646_v40 = vpop.permute.xlu0 %645  ;;  %1346 = vmatprep.subr.bf16.mxu0 %v1509_v13 }
 0x27f   :  { %v1426_v32 = vpop.eup %1425  ;;  %v765_v18 = vadd.f32 1.0, %v1424_v38  ;;  %v697_v15 = vmul.f32 %v1574_v20, %v646_v40 }
 0x280   :  { %v799_v34 = vmul.f32 %v1426_v32, %v1788_v30  ;;  %1431 = vpow2.f32 %v1225_v24  ;;  %v708_v36 = vadd.f32 %v696_v31, %v684_v41 }
 0x281   :  { %1433 = vrcp.f32 %v765_v18  ;;  %v601_v37 = vpop.permute.xlu1 %600  ;;  %1348 = vmatpush3.bf16.msra.mxu0 %v1347_v1 }
 0x282   :  { %v720_v42 = vadd.f32 %v1588_v29, %v708_v36  ;;  %v673_v43 = vmul.f32 %v1562_v14, %v601_v37  ;;  %1301 = vmatprep.mubr.msk.f32.mxu1 %vm215_vm0, %v799_v34  ;;  %1349 = vmatprep.subr.bf16.mxu0 %v1509_v13 }
 0x284   :  { %v1428_v44 = vpop.eup %1427  ;;  %v1226_v45 = vmul.f32 -1.442695, %v720_v42  ;;  %v685_v46 = vadd.f32 %v673_v43, %v661_v49 }
 0x285   :  { %v1430_v47 = vpop.eup %1429  ;;  %v766_v30 = vadd.f32 1.0, %v1428_v44  ;;  %v605_v48 = vpop.permute.xlu1 %604 }
 0x286   :  { %v800_v50 = vmul.f32 %v1430_v47, %v1794_v16  ;;  %1435 = vpow2.f32 %v1226_v45  ;;  %v709_v35 = vadd.f32 %v697_v15, %v685_v46  ;;  %v674_v51 = vmul.f32 %v1562_v14, %v605_v48 }
 0x287   :  { %1437 = vrcp.f32 %v766_v30 }
 0x288   :  { %v721_v55 = vadd.f32 %v1588_v29, %v709_v35  ;;  %1302 = vmatmul.mubr.msk.f32.gmra.mrb[4].mxu1 %vm215_vm0, %v800_v50  ;;  %v686_v2 = vadd.f32 %v674_v51, %v662_v53 }
 0x289   :  { %v650_v56 = vpop.permute.xlu1 %649 }
 0x28a   :  { %v1432_v58 = vpop.eup %1431  ;;  %v1227_v60 = vmul.f32 -1.442695, %v721_v55  ;;  %v698_v5 = vmul.f32 %v1574_v20, %v650_v56 }
 0x28b   :  { %v1434_v8 = vpop.eup %1433  ;;  %v767_v59 = vadd.f32 1.0, %v1432_v58 }
 0x28c   :  { %v801_v16 = vmul.f32 %v1434_v8, %v1804_v0  ;;  %1439 = vpow2.f32 %v1227_v60  ;;  %v710_v54 = vadd.f32 %v698_v5, %v686_v2 }
 0x28d   :  { %1441 = vrcp.f32 %v767_v59 }
 0x28e   :  { %v722_v14 = vadd.f32 %v1588_v29, %v710_v54  ;;  %1304 = vmatprep.mubr.msk.f32.mxu1 %vm215_vm0, %v801_v16 }
 0x290   :  { %v1436_v17 = vpop.eup %1435  ;;  %v1228_v61 = vmul.f32 -1.442695, %v722_v14 }
 0x291   :  { %v1438_v3 = vpop.eup %1437  ;;  %v768_v6 = vadd.f32 1.0, %v1436_v17 }
 0x292   :  { %v802_v7 = vmul.f32 %v1438_v3, %v1812_v62  ;;  %1443 = vpow2.f32 %v1228_v61 }
 0x293   :  { %1445 = vrcp.f32 %v768_v6 }
 0x294   :  { %1305 = vmatmul.mubr.msk.f32.gmra.mrb[6].mxu1 %vm215_vm0, %v802_v7 }
 0x296   :  { %v1440_v20 = vpop.eup %1439 }
 0x297   :  { %v1442_v9 = vpop.eup %1441  ;;  %v769_v0 = vadd.f32 1.0, %v1440_v20 }
 0x298   :  { %v803_v25 = vmul.f32 %v1442_v9, %v719_v23 }
 0x299   :  { %1447 = vrcp.f32 %v769_v0 }
 0x29a   :  { %1307 = vmatprep.mubr.msk.f32.mxu1 %vm215_vm0, %v803_v25 }
 0x29c   :  { %v1444_v29 = vpop.eup %1443 }
 0x29d   :  { %v1446_v10 = vpop.eup %1445  ;;  %v770_v63 = vadd.f32 1.0, %v1444_v29 }
 0x29e   :  { %v804_v4 = vmul.f32 %v1446_v10, %v720_v42 }
 0x29f   :  { %1449 = vrcp.f32 %v770_v63 }
 0x2a0   :  { %1308 = vmatmul.mubr.msk.f32.gmra.mrb[8].mxu1 %vm215_vm0, %v804_v4 }
 0x2a3   :  { %v1448_v11 = vpop.eup %1447 }
 0x2a4   :  { %v805_v62 = vmul.f32 %v1448_v11, %v721_v55 }
 0x2a6   :  { %1310 = vmatprep.mubr.msk.f32.mxu1 %vm215_vm0, %v805_v62 }
 0x2a9   :  { %v1450_v19 = vpop.eup %1449 }
 0x2aa   :  { %v806_v33 = vmul.f32 %v1450_v19, %v722_v14 }
 0x2ac   :  { %1311 = vmatmul.mubr.msk.f32.gmra.mrb[10].mxu1 %vm215_vm0, %v806_v33  ;;  %vm1019_vm0 = vcmask 1041409  }
 0x343   :  { %v1297_v27 = vpop.f32.mrb[0].mxu1 }
 0x344   :  { %v909_v23 = vpop.f32.mrb[1].mxu1  ;;  %v915_v28 = vadd.f32 %v1297_v27, %v1650_v52 }
 0x345   :  { %v910_v38 = vadd.f32 %v1650_v52, %v909_v23 }
 0x346   :  { %v969_v18 = vsel %vm329_vm1, %v915_v28, -inf }
 0x347   :  { %v968_v36 = vsel %vm329_vm1, %v910_v38, -inf }
 0x34f   :  { %v1300_v24 = vpop.f32.mrb[2].mxu1 }
 0x350   :  { %v925_v41 = vadd.f32 %v1300_v24, %v1650_v52  ;;  %v919_v31 = vpop.f32.mrb[3].mxu1  ;;  %v1103_v24 = vld [vmem:[#allocation2 + $0x58] sm:$0xff] }
 0x351   :  { %v920_v32 = vadd.f32 %v1650_v52, %v919_v31  ;;  %v1104_v31 = vld [vmem:[#allocation2 + $0x60] sm:$0xff] }
 0x352   :  { %v972_v34 = vsel %vm329_vm1, %v925_v41, -inf }
 0x353   :  { %v973_v37 = vmax.f32 %v969_v18, %v972_v34  ;;  %v970_v40 = vsel %vm329_vm1, %v920_v32, -inf  ;;  %v1105_v32 = vld [vmem:[#allocation2 + $0x68] sm:$0xff] }
 0x354   :  { %v971_v49 = vmax.f32 %v968_v36, %v970_v40  ;;  %v1353_v18 = vpack.c.bf16 %v1105_v32, %v1104_v31  ;;  %v1241_v34 = vld [vmem:[#allocation2 + $0x48] ss:$0 sm:$0xff] }
 0x356   :  { %v974_v42 = vmax.f32 %v971_v49, %v973_v37 }
 0x358   :  { %v975_v45 = vrot.slane %v974_v42, 4 }
 0x35a   :  { %v976_v35 = vmax.f32 %v974_v42, %v975_v45  ;;  %v1244_v45 = vld [vmem:[#allocation2 + $0x70] ss:$0 sm:$0xff] }
 0x35b   :  { %v1303_v43 = vpop.f32.mrb[4].mxu1 }
 0x35c   :  { %v929_v44 = vpop.f32.mrb[5].mxu1  ;;  %v935_v46 = vadd.f32 %v1303_v43, %v1650_v52  ;;  %v977_v2 = vrot.slane %v976_v35, 2 }
 0x35d   :  { %v930_v15 = vadd.f32 %v1650_v52, %v929_v44 }
 0x35e   :  { %v982_v51 = vsel %vm329_vm1, %v935_v46, -inf  ;;  %v978_v59 = vmax.f32 %v976_v35, %v977_v2 }
 0x35f   :  { %v981_v55 = vsel %vm329_vm1, %v930_v15, -inf }
 0x360   :  { %v979_v61 = vrot.slane %v978_v59, 1 }
 0x362   :  { %v980_v7 = vmax.f32 %v978_v59, %v979_v61 }
 0x367   :  { %v1306_v47 = vpop.f32.mrb[6].mxu1 }
 0x368   :  { %v945_v30 = vadd.f32 %v1306_v47, %v1650_v52  ;;  %v939_v48 = vpop.f32.mrb[7].mxu1 }
 0x369   :  { %v940_v50 = vadd.f32 %v1650_v52, %v939_v48 }
 0x36a   :  { %v985_v53 = vsel %vm329_vm1, %v945_v30, -inf }
 0x36b   :  { %v986_v56 = vmax.f32 %v982_v51, %v985_v53  ;;  %v983_v58 = vsel %vm329_vm1, %v940_v50, -inf }
 0x36c   :  { %v984_v60 = vmax.f32 %v981_v55, %v983_v58 }
 0x36e   :  { %v987_v5 = vmax.f32 %v984_v60, %v986_v56 }
 0x370   :  { %v988_v8 = vrot.slane %v987_v5, 4 }
 0x372   :  { %v989_v16 = vmax.f32 %v987_v5, %v988_v8 }
 0x373   :  { %v1309_v54 = vpop.f32.mrb[8].mxu1 }
 0x374   :  { %v990_v14 = vrot.slane %v989_v16, 2  ;;  %v949_v17 = vpop.f32.mrb[9].mxu1  ;;  %v955_v0 = vadd.f32 %v1309_v54, %v1650_v52 }
 0x375   :  { %v950_v25 = vadd.f32 %v1650_v52, %v949_v17 }
 0x376   :  { %v991_v3 = vmax.f32 %v989_v16, %v990_v14  ;;  %v995_v11 = vsel %vm329_vm1, %v955_v0, -inf }
 0x377   :  { %v994_v19 = vsel %vm329_vm1, %v950_v25, -inf }
 0x378   :  { %v992_v6 = vrot.slane %v991_v3, 1 }
 0x37a   :  { %v993_v20 = vmax.f32 %v991_v3, %v992_v6 }
 0x37c   :  { %v1020_v9 = vsel %vm1019_vm0, %v993_v20, %v980_v7 }
 0x37f   :  { %v1312_v29 = vpop.f32.mrb[10].mxu1 }
 0x380   :  { %v965_v10 = vadd.f32 %v1312_v29, %v1650_v52  ;;  %v959_v63 = vpop.f32.mrb[11].mxu1 }
 0x381   :  { %v960_v4 = vadd.f32 %v1650_v52, %v959_v63  ;;  %v1102_v52 = vld [vmem:[#allocation2 + $0x50] sm:$0xff] }
 0x382   :  { %v998_v62 = vsel %vm329_vm1, %v965_v10, -inf  ;;  %v1350_v41 = vpack.c.bf16 %v1103_v24, %v1102_v52 }
 0x383   :  { %v999_v33 = vmax.f32 %v995_v11, %v998_v62  ;;  %v996_v12 = vsel %vm329_vm1, %v960_v4, -inf }
 0x384   :  { %v997_v39 = vmax.f32 %v994_v19, %v996_v12 }
 0x386   :  { %v1000_v57 = vmax.f32 %v997_v39, %v999_v33 }
 0x388   :  { %v1001_v21 = vrot.slane %v1000_v57, 4 }
 0x38a   :  { %v1002_v22 = vmax.f32 %v1000_v57, %v1001_v21 }
 0x38c   :  { %v1003_v1 = vrot.slane %v1002_v22, 2 }
 0x38e   :  { %v1004_v27 = vmax.f32 %v1002_v22, %v1003_v1 }
 0x390   :  { %v1005_v23 = vrot.slane %v1004_v27, 1 }
 0x392   :  { %v1006_v28 = vmax.f32 %v1004_v27, %v1005_v23 }
 0x394   :  { %v1022_v38 = vsel %vm1021_vm13, %v1006_v28, %v1020_v9 }
 0x395   :  { %1322 = vmatmul.mubr.msk.f32.vlgmr.msra.gmra.mrb[6].mxu0 %vm329_vm1, %v1022_v38 }
 0x396   :  { %1332 = vmatprep.mubr.msk.f32.mxu0 %vm1510_vm12, %v1511_v26  ;;  %1351 = vmatpush3.bf16.msra.mxu0 %v1350_v41 }
 0x397   :  { %1352 = vmatprep.subr.bf16.mxu0 %v1509_v13 }
 0x39a   :  { %1354 = vmatpush3.bf16.msra.mxu0 %v1353_v18 }
 0x468   :  { %v1091_v36 = vpop.f32.mrb[6].mxu0 }
 0x469   :  { %v1092_v37 = vadd.f32 %v1241_v34, %v1091_v36  ;;  %v1323_v40 = vpop.f32.mrb[7].mxu0 }
 0x46b   :  { %v1243_v49 = vmul.f32 -1.442695, %v1092_v37 }
 0x46d   :  { %1451 = vpow2.f32 %v1243_v49 }
 0x477   :  { %v1452_v42 = vpop.eup %1451 }
 0x478   :  { %v1098_v43 = vadd.f32 1.0, %v1452_v42 }
 0x47a   :  { %1453 = vrcp.f32 %v1098_v43 }
 0x484   :  { %v1454_v26 = vpop.eup %1453 }
 0x485   :  { %v1101_v44 = vmul.f32 %v1454_v26, %v1092_v37 }
 0x487   :  { %1333 = vmatmul.mubr.msk.f32.vlgmr.msra.gmra.mrb[8].mxu0 %vm329_vm1, %v1101_v44 }
 0x55a   :  { %v1180_v13 = vpop.f32.mrb[8].mxu0 }
 0x55b   :  { %v1181_v46 = vadd.f32 %v1244_v45, %v1180_v13  ;;  %v1334_v15 = vpop.f32.mrb[9].mxu0 }
 0x55d   :  { %1184 = vst [vmem:[#allocation5] sm:$0x7] %v1181_v46 }
 0x55e   :  { %1488 = shalt.err (!%p1485_p12)
}
 0x55f   :  { %s1489_s10 = scalar_lea.hbm %s1893_s2, 64 }
 0x560   :  { %p1490_p13 = scmp.ne.s32.totalorder %s1893_s2, %s1489_s10  ;;  %p1493_p0 = scmp.lt.u32.totalorder %s1489_s10, %s1893_s2 }
 0x562   :  { %p1495_p1 = pnand %p1493_p0, %p1490_p13 }
 0x564   :  { %1498 = shalt.err (!%p1495_p1)
}
 0x565   :  { %1194 = dma.vmem_to_hbm [thread:$0]  %s1192_s6, 64, %s1893_s2, [#allocation4]  }
 0x566   :  { %1501 = dma.done.wait [#allocation4], 64  }
 0x567   :  { %1502 = vsyncadd [#allocation4], 4294967232 }
 0x568   :  { %1198 = vsyncpa [#allocation3], 1 }
 0x569   :  { %1199 = vsyncpa [#allocation4], 1 }

</bundles_post_ra>
